<compile_context>
chip_gen: v7x
topology: tpu7x:2x2x1
jax: 0.10.0
libtpu: 0.0.40
codegen_flags: <defaults>
</compile_context>

<pallas_src>
import functools
import math

import jax
import jax.numpy as jnp
from jax.experimental import pallas as pl
from jax.experimental.pallas import tpu as pltpu


def make_divisible_by_8(v):
    new_v = max(8, int(v + 4) // 8 * 8)
    if new_v < 0.9 * v:
        new_v += 8
    return new_v


_LANE = 128
_SUBLANE = 8


def _round_up(x, m):
    return -(-x // m) * m


def _vmem_budget_bytes():
    """Usable VMEM budget: 75% of physical capacity (64 MiB/TC default = v7x-safe)."""
    cap = 64 * 1024 * 1024
    try:
        info = pltpu.get_tpu_info()
        cap = int(getattr(info, "vmem_capacity_bytes", cap)) or cap
    except Exception:
        pass
    return int(cap * 0.75)


# ---------------------------------------------------------------------------
# Fused single-pass kernel: one batch element per grid step.
# ---------------------------------------------------------------------------
def _se_fused_kernel(inv_hw, x_ref, w1t_ref, b1_ref, w2t_ref, b2_ref, o_ref):
    """x_ref/o_ref: (1, C, HW) native dtype; weights are f32 residents."""
    xf = x_ref[...].astype(jnp.float32)                              # (1, C, HW)
    y = jnp.sum(xf, axis=-1) * inv_hw                                # pooled mean (1, C)
    h = jnp.dot(y, w1t_ref[...],
                preferred_element_type=jnp.float32) + b1_ref[...]    # (1, HID)
    h = h * jax.nn.sigmoid(h)                                        # SiLU (EUP)
    s = jax.nn.sigmoid(
        jnp.dot(h, w2t_ref[...],
                preferred_element_type=jnp.float32) + b2_ref[...])   # (1, C)
    o_ref[...] = (xf * s[:, :, None]).astype(o_ref.dtype)


# ---------------------------------------------------------------------------
# Two-pass fallback kernels (only for slabs that don't fit VMEM).
# ---------------------------------------------------------------------------
def _se_pool_mlp_kernel(inv_hw, hw, blk, x_ref, w1t_ref, b1_ref, w2t_ref, b2_ref,
                        s_ref, acc_ref):
    """Pass 1: masked lane-sums per spatial chunk, per-batch MLP at the end.

    x_ref  : (1, C, blk) native dtype — current spatial chunk of batch b
    acc_ref: (1, C, 1)   f32 scratch — running channel sums
    s_ref  : (1, C, 1)   f32 output — per-batch scale (resident over spatial axis)
    """
    sp = pl.program_id(1)

    @pl.when(sp == 0)
    def _init():
        acc_ref[...] = jnp.zeros_like(acc_ref)

    # Mask the ragged lane tail (OOB lanes of a partial block are NOT zero),
    # then reduce this chunk to (1, C, 1) — no full-block accumulator needed.
    lane = jax.lax.broadcasted_iota(jnp.int32, x_ref.shape, dimension=2)
    valid = lane < (hw - sp * blk)
    xf = jnp.where(valid, x_ref[...].astype(jnp.float32), 0.0)
    acc_ref[...] += jnp.sum(xf, axis=-1, keepdims=True)

    @pl.when(sp == pl.num_programs(1) - 1)
    def _finalize():
        y = acc_ref[...][:, :, 0] * inv_hw                           # (1, C)
        h = jnp.dot(y, w1t_ref[...],
                    preferred_element_type=jnp.float32) + b1_ref[...]
        h = h * jax.nn.sigmoid(h)                                    # SiLU
        s = jax.nn.sigmoid(
            jnp.dot(h, w2t_ref[...],
                    preferred_element_type=jnp.float32) + b2_ref[...])
        s_ref[...] = s[:, :, None]


def _se_scale_kernel(x_ref, s_ref, o_ref):
    """Pass 2: pure streaming scale, o = x * s (s broadcast over lanes)."""
    o_ref[...] = (x_ref[...].astype(jnp.float32) * s_ref[...]).astype(o_ref.dtype)


# ---------------------------------------------------------------------------
# Wrapper
# ---------------------------------------------------------------------------
def se_layer_pallas(x_nchw, w1, b1, w2, b2, *, force_two_pass=False,
                    block_bytes_cap=None):
    """x_nchw: (B, C, H, W).  w1: (HID, C), b1: (HID,), w2: (C, HID), b2: (C,)."""
    B, C, H, W = x_nchw.shape
    HID = w1.shape[0]
    hw = H * W
    dtype = x_nchw.dtype
    itemsize = x_nchw.dtype.itemsize
    inv_hw = 1.0 / float(hw)

    # Free metadata reshape (merges contiguous trailing dims): no HBM copy.
    x_flat = x_nchw.reshape(B, C, hw)

    # Tiny pre-transposed f32 weights; constant index_map -> DMA'd once.
    w1t = jnp.asarray(w1, jnp.float32).T                 # (C, HID)
    w2t = jnp.asarray(w2, jnp.float32).T                 # (HID, C)
    b1_2d = jnp.asarray(b1, jnp.float32).reshape(1, HID)
    b2_2d = jnp.asarray(b2, jnp.float32).reshape(1, C)

    budget = _vmem_budget_bytes()
    vmem_limit = budget

    # VMEM footprint of one (1, C, HW) slab with internal (8, 128) tiling.
    c_pad = _round_up(C, _SUBLANE)
    slab_bytes = c_pad * _round_up(hw, _LANE) * itemsize
    weight_bytes = 2 * 4 * (c_pad * _round_up(HID, _LANE)
                            + _round_up(HID, _SUBLANE) * _round_up(C, _LANE)
                            + 2 * _SUBLANE * _round_up(max(HID, C), _LANE))
    fused_fits = (4 * slab_bytes + weight_bytes + (2 << 20)) <= budget

    if fused_fits and not force_two_pass:
        # ---- Fused single pass: x read from HBM exactly once.
        out = pl.pallas_call(
            functools.partial(_se_fused_kernel, inv_hw),
            out_shape=jax.ShapeDtypeStruct((B, C, hw), dtype),
            grid_spec=pltpu.PrefetchScalarGridSpec(
                num_scalar_prefetch=0,
                grid=(B,),
                in_specs=[
                    pl.BlockSpec((1, C, hw), lambda b: (b, 0, 0)),   # x slab
                    pl.BlockSpec((C, HID), lambda b: (0, 0)),        # w1t (resident)
                    pl.BlockSpec((1, HID), lambda b: (0, 0)),        # b1
                    pl.BlockSpec((HID, C), lambda b: (0, 0)),        # w2t
                    pl.BlockSpec((1, C), lambda b: (0, 0)),          # b2
                ],
                out_specs=pl.BlockSpec((1, C, hw), lambda b: (b, 0, 0)),
            ),
            compiler_params=pltpu.CompilerParams(
                dimension_semantics=("parallel",),
                vmem_limit_bytes=vmem_limit),
        )(x_flat, w1t, b1_2d, w2t, b2_2d)
        return out.reshape(B, C, H, W)

    # ---- Two-pass fallback for slabs too large for VMEM.
    # Spatial block: lane-dense multiple of 128, sized so the 4 streaming block
    # buffers of pass 2 (+ pass-1 double buffer) stay well inside the budget.
    if block_bytes_cap is None:
        block_bytes_cap = min(8 << 20, budget // 8)
    max_lanes = max(_LANE, (block_bytes_cap // (c_pad * itemsize)) // _LANE * _LANE)
    blk = min(_round_up(hw, _LANE), max_lanes)
    n_sp = -(-hw // blk)

    # Pass 1: pooled mean + excitation MLP -> per-batch scale s (B, C, 1) f32.
    s_out = pl.pallas_call(
        functools.partial(_se_pool_mlp_kernel, inv_hw, hw, blk),
        out_shape=jax.ShapeDtypeStruct((B, C, 1), jnp.float32),
        grid_spec=pltpu.PrefetchScalarGridSpec(
            num_scalar_prefetch=0,
            grid=(B, n_sp),                                 # reduction axis last
            in_specs=[
                pl.BlockSpec((1, C, blk), lambda b, sp: (b, 0, sp)),
                pl.BlockSpec((C, HID), lambda b, sp: (0, 0)),
                pl.BlockSpec((1, HID), lambda b, sp: (0, 0)),
                pl.BlockSpec((HID, C), lambda b, sp: (0, 0)),
                pl.BlockSpec((1, C), lambda b, sp: (0, 0)),
            ],
            out_specs=pl.BlockSpec((1, C, 1), lambda b, sp: (b, 0, 0)),
            scratch_shapes=[pltpu.VMEM((1, C, 1), jnp.float32)],
        ),
        compiler_params=pltpu.CompilerParams(
            dimension_semantics=("parallel", "arbitrary"),
            vmem_limit_bytes=vmem_limit),
    )(x_flat, w1t, b1_2d, w2t, b2_2d)

    # Pass 2: streaming scale. (v5e: if profiling shows exposed DMA, add
    # pipeline_mode=pl.Buffered(3) to the x in_spec below.)
    out = pl.pallas_call(
        _se_scale_kernel,
        out_shape=jax.ShapeDtypeStruct((B, C, hw), dtype),
        grid_spec=pltpu.PrefetchScalarGridSpec(
            num_scalar_prefetch=0,
            grid=(B, n_sp),
            in_specs=[
                pl.BlockSpec((1, C, blk), lambda b, sp: (b, 0, sp)),
                pl.BlockSpec((1, C, 1), lambda b, sp: (b, 0, 0)),
            ],
            out_specs=pl.BlockSpec((1, C, blk), lambda b, sp: (b, 0, sp)),
        ),
        compiler_params=pltpu.CompilerParams(
            dimension_semantics=("parallel", "parallel"),
            vmem_limit_bytes=vmem_limit),
    )(x_flat, s_out)

    return out.reshape(B, C, H, W)


def se_layer_ref(x_nchw, w1, b1, w2, b2):
    """Pure-JAX reference matching the PyTorch forward."""
    y = jnp.mean(x_nchw.astype(jnp.float32), axis=(2, 3))      # (B, C)
    h = y @ w1.T + b1
    h = h * jax.nn.sigmoid(h)                                  # SiLU
    s = jax.nn.sigmoid(h @ w2.T + b2)                          # (B, C)
    return (x_nchw.astype(jnp.float32) * s[:, :, None, None]).astype(x_nchw.dtype)


if __name__ == "__main__":
    # SELayer(inp=4, oup=4, reduction=4) -> hidden = make_divisible_by_8(1) = 8
    inp = oup = C = 4
    reduction = 4
    HID = make_divisible_by_8(inp // reduction)                # 8
    B, H, W = 2, 16, 16

    key = jax.random.PRNGKey(0)
    kx, k1, k2, k3, k4 = jax.random.split(key, 5)

    x = jax.random.normal(kx, (B, C, H, W), dtype=jnp.float32)

    bound1 = 1.0 / math.sqrt(oup)
    w1 = jax.random.uniform(k1, (HID, oup), jnp.float32, -bound1, bound1)
    b1 = jax.random.uniform(k2, (HID,), jnp.float32, -bound1, bound1)
    bound2 = 1.0 / math.sqrt(HID)
    w2 = jax.random.uniform(k3, (oup, HID), jnp.float32, -bound2, bound2)
    b2 = jax.random.uniform(k4, (oup,), jnp.float32, -bound2, bound2)

    ref = se_layer_ref(x, w1, b1, w2, b2)

    # 1) Fused single-pass path (the common case).
    out = jax.block_until_ready(jax.jit(se_layer_pallas)(x, w1, b1, w2, b2))
    assert out.shape == (B, C, H, W)
    assert jnp.allclose(out, ref, atol=1e-5, rtol=1e-5), "fused path mismatch"

    # 2) Two-pass fallback with a ragged spatial tail (forced small blocks).
    x2 = jax.random.normal(kx, (B, C, 15, 15), dtype=jnp.float32)
    ref2 = se_layer_ref(x2, w1, b1, w2, b2)
    two_pass = jax.jit(functools.partial(
        se_layer_pallas, force_two_pass=True, block_bytes_cap=4096))
    out2 = jax.block_until_ready(two_pass(x2, w1, b1, w2, b2))
    assert jnp.allclose(out2, ref2, atol=1e-5, rtol=1e-5), "two-pass path mismatch"

    # 3) Native-bf16 streaming (f32 accumulate / MLP inside the kernel).
    xb = x.astype(jnp.bfloat16)
    outb = jax.block_until_ready(jax.jit(se_layer_pallas)(xb, w1, b1, w2, b2))
    assert outb.dtype == jnp.bfloat16
    assert jnp.allclose(outb.astype(jnp.float32), ref, atol=0.1, rtol=0.1), \
        "bf16 path mismatch"

    print("KERNEL_OK")
</pallas_src>

<mosaic_0001>
module attributes {stable_mosaic.version = 11 : i64} {
  func.func @_se_fused_kernel(%arg0: i32, %arg1: memref<1x4x256xf32, #tpu.memory_space<vmem>>, %arg2: memref<4x8xf32, #tpu.memory_space<vmem>>, %arg3: memref<1x8xf32, #tpu.memory_space<vmem>>, %arg4: memref<8x4xf32, #tpu.memory_space<vmem>>, %arg5: memref<1x4xf32, #tpu.memory_space<vmem>>, %arg6: memref<1x4x256xf32, #tpu.memory_space<vmem>>) attributes {dimension_semantics = [#tpu.dimension_semantics<parallel>], iteration_bounds = array<i64: 2>, scalar_prefetch = 0 : i64, scratch_operands = 0 : i64, tpu.core_type = #tpu.core_type<tc>, window_params = [{transform_indices = @transform_0, window_bounds = array<i64: 1, 4, 256>}, {pipeline_mode = #tpu.pipeline_mode<synchronous>, transform_indices = @transform_1, window_bounds = array<i64: 4, 8>}, {pipeline_mode = #tpu.pipeline_mode<synchronous>, transform_indices = @transform_2, window_bounds = array<i64: 1, 8>}, {pipeline_mode = #tpu.pipeline_mode<synchronous>, transform_indices = @transform_3, window_bounds = array<i64: 8, 4>}, {pipeline_mode = #tpu.pipeline_mode<synchronous>, transform_indices = @transform_4, window_bounds = array<i64: 1, 4>}, {transform_indices = @transform_5, window_bounds = array<i64: 1, 4, 256>}]} {
    %c0 = arith.constant 0 : index
    %c0_0 = arith.constant 0 : index
    %c0_1 = arith.constant 0 : index
    %0 = vector.load %arg1[%c0, %c0_0, %c0_1] : memref<1x4x256xf32, #tpu.memory_space<vmem>>, vector<1x4x256xf32>
    %cst = arith.constant dense<0.000000e+00> : vector<1x4xf32>
    %1 = vector.multi_reduction <add>, %0, %cst [2] : vector<1x4x256xf32> to vector<1x4xf32>
    %cst_2 = arith.constant 3.906250e-03 : f32
    %2 = vector.broadcast %cst_2 : f32 to vector<1x4xf32>
    %3 = arith.mulf %1, %2 : vector<1x4xf32>
    %c0_3 = arith.constant 0 : index
    %c0_4 = arith.constant 0 : index
    %4 = vector.load %arg2[%c0_3, %c0_4] : memref<4x8xf32, #tpu.memory_space<vmem>>, vector<4x8xf32>
    %cst_5 = arith.constant dense<0.000000e+00> : vector<1x8xf32>
    %5 = tpu.matmul %3, %4, %cst_5 {dimension_numbers = #tpu.dot_dimension_numbers<[1], [0], [0], [1], [0, 0, 1, 1], [], []>} : vector<1x4xf32>, vector<4x8xf32>, vector<1x8xf32> -> vector<1x8xf32>
    %c0_6 = arith.constant 0 : index
    %c0_7 = arith.constant 0 : index
    %6 = vector.load %arg3[%c0_6, %c0_7] : memref<1x8xf32, #tpu.memory_space<vmem>>, vector<1x8xf32>
    %7 = arith.addf %5, %6 : vector<1x8xf32>
    %8 = arith.negf %7 : vector<1x8xf32>
    %9 = math.exp %8 : vector<1x8xf32>
    %cst_8 = arith.constant 1.000000e+00 : f32
    %10 = vector.broadcast %cst_8 : f32 to vector<1x8xf32>
    %11 = arith.addf %10, %9 : vector<1x8xf32>
    %12 = arith.divf %10, %11 : vector<1x8xf32>
    %13 = arith.mulf %7, %12 : vector<1x8xf32>
    %c0_9 = arith.constant 0 : index
    %c0_10 = arith.constant 0 : index
    %14 = vector.load %arg4[%c0_9, %c0_10] : memref<8x4xf32, #tpu.memory_space<vmem>>, vector<8x4xf32>
    %cst_11 = arith.constant dense<0.000000e+00> : vector<1x4xf32>
    %15 = tpu.matmul %13, %14, %cst_11 {dimension_numbers = #tpu.dot_dimension_numbers<[1], [0], [0], [1], [0, 0, 1, 1], [], []>} : vector<1x8xf32>, vector<8x4xf32>, vector<1x4xf32> -> vector<1x4xf32>
    %c0_12 = arith.constant 0 : index
    %c0_13 = arith.constant 0 : index
    %16 = vector.load %arg5[%c0_12, %c0_13] : memref<1x4xf32, #tpu.memory_space<vmem>>, vector<1x4xf32>
    %17 = arith.addf %15, %16 : vector<1x4xf32>
    %18 = arith.negf %17 : vector<1x4xf32>
    %19 = math.exp %18 : vector<1x4xf32>
    %cst_14 = arith.constant 1.000000e+00 : f32
    %20 = vector.broadcast %cst_14 : f32 to vector<1x4xf32>
    %21 = arith.addf %20, %19 : vector<1x4xf32>
    %22 = arith.divf %20, %21 : vector<1x4xf32>
    %23 = vector.shape_cast %22 : vector<1x4xf32> to vector<1x4x1xf32>
    %24 = vector.broadcast %23 : vector<1x4x1xf32> to vector<1x4x256xf32>
    %25 = arith.mulf %0, %24 : vector<1x4x256xf32>
    %c0_15 = arith.constant 0 : index
    %c0_16 = arith.constant 0 : index
    %c0_17 = arith.constant 0 : index
    %26 = vector.load %arg6[%c0_15, %c0_16, %c0_17] : memref<1x4x256xf32, #tpu.memory_space<vmem>>, vector<1x4x256xf32>
    tpu.vector_store %arg6[%c0_15, %c0_16, %c0_17], %25 {strides = array<i32>} : memref<1x4x256xf32, #tpu.memory_space<vmem>>, vector<1x4x256xf32>,
    return
  }
  func.func @transform_0(%arg0: i32) -> (i32, i32, i32) {
    %c0_i32 = arith.constant 0 : i32
    %c0_i32_0 = arith.constant 0 : i32
    %c0_i32_1 = arith.constant 0 : i32
    return %arg0, %c0_i32, %c0_i32_0 : i32, i32, i32
  }
  func.func @transform_1(%arg0: i32) -> (i32, i32) {
    %c0_i32 = arith.constant 0 : i32
    %c0_i32_0 = arith.constant 0 : i32
    %c0_i32_1 = arith.constant 0 : i32
    return %c0_i32, %c0_i32_0 : i32, i32
  }
  func.func @transform_2(%arg0: i32) -> (i32, i32) {
    %c0_i32 = arith.constant 0 : i32
    %c0_i32_0 = arith.constant 0 : i32
    %c0_i32_1 = arith.constant 0 : i32
    return %c0_i32, %c0_i32_0 : i32, i32
  }
  func.func @transform_3(%arg0: i32) -> (i32, i32) {
    %c0_i32 = arith.constant 0 : i32
    %c0_i32_0 = arith.constant 0 : i32
    %c0_i32_1 = arith.constant 0 : i32
    return %c0_i32, %c0_i32_0 : i32, i32
  }
  func.func @transform_4(%arg0: i32) -> (i32, i32) {
    %c0_i32 = arith.constant 0 : i32
    %c0_i32_0 = arith.constant 0 : i32
    %c0_i32_1 = arith.constant 0 : i32
    return %c0_i32, %c0_i32_0 : i32, i32
  }
  func.func @transform_5(%arg0: i32) -> (i32, i32, i32) {
    %c0_i32 = arith.constant 0 : i32
    %c0_i32_0 = arith.constant 0 : i32
    %c0_i32_1 = arith.constant 0 : i32
    return %arg0, %c0_i32, %c0_i32_0 : i32, i32, i32
  }
}

</mosaic_0001>

<bundles_post_ra>
// kernel: se_layer_pallas.1
= control target key start
LH: loop header
LB: loop body
LE: loop exit
PB: predicated region body
PF: predicated region fallthrough
CT: control target
= control target key end

     0   :  { %s576_s18 = smov 0   ;;  %s612_s0 = inlined_call_operand.vmem [shape: f32[2,4,256], index: 0, kind: input, shape index: {}]   ;;  %s613_s1 = inlined_call_operand.vmem [shape: f32[4,8], index: 1, kind: input, shape index: {}]   ;;  %s614_s2 = inlined_call_operand.vmem [shape: f32[1,8], index: 2, kind: input, shape index: {}]   ;;  %s615_s3 = inlined_call_operand.vmem [shape: f32[8,4], index: 3, kind: input, shape index: {}]   ;;  %s616_s4 = inlined_call_operand.vmem [shape: f32[1,4], index: 4, kind: input, shape index: {}]   ;;  %s617_s5 = inlined_call_operand.vmem [shape: f32[2,4,256], index: 5, kind: output, shape index: {}]  }
   0x1 LB: > { %s483_s19 = sadd.s32 4294967295, %s541_s18   ;;  %p487_p0 = scmp.ge.s32.totalorder %s541_s18, 1  ;;  %s541_s18 = sphi %s576_s18, %s15_s18  }
   0x2   : > { %p187_p1 = scmp.lt.s32.totalorder %s541_s18, 3 }
   0x4   : > { %p188_p2 = pnand %p487_p0, %p187_p1 }
   0x5   : > { %p215_p3 = scmp.lt.s32.totalorder (!%p188_p2), %s483_s19, 1  ;;  %vm229_vm0 = vcmask (!%p188_p2), 1043456   ;;  %v543_v5 = vmov (!%p188_p2), 0.0   ;;  %v236_v6 = vld [vmem:[%s613_s1] sm:$0xf] (!%p188_p2)  ;;  %vm544_vm1 = vmmov (!%p188_p2), 0   ;;  %v239_v7 = vlaneseq (!%p188_p2) }
   0x6   : > { %191 = sbr.rel (%p188_p2) target bundleno = 772 (0x304), region = 40  ;;  %505 = vmatprep.subr.mxu0 (!%p188_p2), %v543_v5  ;;  %510 = vmatprep.subr.mxu1 (!%p188_p2), %v543_v5  ;;  %vm245_vm2 = vcmask (!%p188_p2), 31744   ;;  %v328_v14 = vld [vmem:[%s615_s3] sm:$0xff] (!%p188_p2)  ;;  %vm330_vm3 = vcmask (!%p188_p2), 64512   ;;  %v545_v34 = vmov (!%p188_p2), 839922192  }
   0x7   : > { %506 = vmatpush3.msk.msra.mxu0 (!%p188_p2), %vm229_vm0, %v236_v6  ;;  %507 = vmatprep.mubr.msk.f32.mxu0 (!%p188_p2), %vm544_vm1, %v543_v5  ;;  %v240_v8 = vand.u32 (!%p188_p2), 127, %v239_v7  ;;  %v242_v9 = vshrl.u32 (!%p188_p2), %v239_v7, 7  ;;  %v237_v15 = vld [vmem:[%s614_s2] sm:$0x1] (!%p188_p2)  ;;  %v419_v35 = vunpack.c.l.s4 (!%p188_p2), %v545_v34 }
   0x8   : > { %512 = vmatprep.mubr.msk.f32.mxu1 (!%p188_p2), %vm544_vm1, %v543_v5  ;;  %511 = vmatpush3.msra.mxu1 (!%p188_p2), %v328_v14  ;;  %v329_v24 = vld [vmem:[%s616_s4] sm:$0x1] (!%p188_p2) }
   0x9   : > { %v243_v10 = vsub.s32 (!%p188_p2), %v240_v8, %v242_v9  ;;  %v412_v31 = vsub.s32 (!%p188_p2), 0, %v242_v9  ;;  %v420_v36 = vunpack.c.0.s8 (!%p188_p2), %v419_v35 }
   0xb   : > { %v423_v37 = vsub.s32 (!%p188_p2), %v420_v36, %v242_v9 }
   0xd   : > { %s619_s19 = smov (!%p215_p3, %s483_s19), 1 }
   0xe   : > { %s499_s20 = sshll.u32 %s619_s19, 3 }
   0xf   : > { %s219_s23 = scalar_lea.vmem %s612_s0, %s499_s20  ;;  %s224_s9 = scalar_lea.vmem %s617_s5, %s499_s20 }
  0x10   : > { %v225_v0 = vld [vmem:[%s219_s23] sm:$0xff] }
  0x11   : > { %v227_v1 = vcombine.high %v225_v0, %v225_v0  ;;  %v230_v2 = vsel %vm229_vm0, %v225_v0, 0.0 }
  0x13   : > { %v231_v3 = vsel %vm229_vm0, %v227_v1, 0.0 }
  0x14   : > { %v232_v4 = vadd.f32 %v231_v3, %v230_v2 }
  0x16   : > { %233 = vadd.xlane.f32.xlu0 %v232_v4 }
  0xa3   : > { %v234_v11 = vpop.xlane.xlu0 %233 }
  0xa4   : > { %v235_v12 = vmul.f32 0.00390625, %v234_v11 }
  0xa6   : > { %v244_v13 = vrot.slane %v235_v12, %v243_v10 }
  0xa8   : > { %508 = vmatmul.mubr.msk.f32.vlgmr.msra.gmra.mrb[0].mxu0 %vm245_vm2, %v244_v13 }
 0x17b   : > { %v317_v16 = vpop.f32.mrb[0].mxu0 }
 0x17c   : > { %v318_v17 = vadd.f32 %v317_v16, %v237_v15  ;;  %v509_v18 = vpop.f32.mrb[1].mxu0 }
 0x17e   : > { %v494_v19 = vmul.f32 -1.442695, %v318_v17 }
 0x180   : > { %527 = vpow2.f32 %v494_v19 }
 0x18a   : > { %v528_v20 = vpop.eup %527 }
 0x18b   : > { %v324_v21 = vadd.f32 1.0, %v528_v20 }
 0x18d   : > { %529 = vrcp.f32 %v324_v21 }
 0x197   : > { %v530_v22 = vpop.eup %529 }
 0x198   : > { %v327_v23 = vmul.f32 %v530_v22, %v318_v17 }
 0x19a   : > { %513 = vmatmul.mubr.msk.f32.vlgmr.msra.gmra.mrb[0].mxu1 %vm330_vm3, %v327_v23 }
 0x26d   : > { %v400_v25 = vpop.f32.mrb[0].mxu1 }
 0x26e   : > { %v401_v26 = vadd.f32 %v400_v25, %v329_v24  ;;  %v514_v27 = vpop.f32.mrb[1].mxu1 }
 0x270   : > { %v496_v28 = vmul.f32 -1.442695, %v401_v26 }
 0x272   : > { %531 = vpow2.f32 %v496_v28 }
 0x27c   : > { %v532_v29 = vpop.eup %531 }
 0x27d   : > { %v407_v30 = vadd.f32 1.0, %v532_v29 }
 0x27f   : > { %533 = vrcp.f32 %v407_v30 }
 0x289   : > { %v534_v32 = vpop.eup %533 }
 0x28a   : > { %v413_v33 = vrot.slane %v534_v32, %v412_v31 }
 0x28c   : > { %415 = vbcast.lane.b32.xlu0 %v413_v33, 256 }
 0x2fe   : > { %v416_v38 = vpop.permute.xlu0 %415 }
 0x2ff   : > { %v424_v39 = vrot.slane %v416_v38, %v423_v37 }
 0x301   : > { %v426_v40 = vmul.f32 %v424_v39, %v225_v0 }
 0x303   : > { %427 = vst [vmem:[%s224_s9] sm:$0xff] %v426_v40 }
 0x304 PF: > { %s15_s18 = sadd.s32 1, %s541_s18  }
 0x305   : > { %p12_p4 = scmp.ge.s32.totalorder %s15_s18, 4  }
 0x307   :  { %14 = sbr.rel (!%p12_p4) target bundleno = 1 (0x1), region = 70 }

</bundles_post_ra>
